<compile_context>
chip_gen: v7x
topology: tpu7x:2x2x1
jax: 0.10.0
libtpu: 0.0.40
codegen_flags: <defaults>
</compile_context>

<pallas_src>
import functools

import jax
import jax.numpy as jnp
from jax.experimental import pallas as pl
from jax.experimental.pallas import tpu as pltpu


def make_mlp_kernel(compute_dtype):
    def mlp_kernel(x_ref, w1_ref, b1_ref, w2_ref, b2_ref, w3_ref, b3_ref,
                   w4_ref, b4_ref, o_ref):
        cd = compute_dtype
        # x is read from HBM once as f32; the cast to the MXU input dtype happens here (VPU).
        x = x_ref[...].astype(cd)
        # Layer 1: Linear(input_dim, hidden_dim) + ReLU   (f32 accumulate, f32 bias/activation)
        h = jnp.dot(x, w1_ref[...].astype(cd), preferred_element_type=jnp.float32)
        h = jnp.maximum(h + b1_ref[...], 0.0)
        # Dropout(0.2): identity in inference mode.
        # Layer 2: Linear(hidden_dim, 32) + ReLU
        h = jnp.dot(h.astype(cd), w2_ref[...].astype(cd), preferred_element_type=jnp.float32)
        h = jnp.maximum(h + b2_ref[...], 0.0)
        # Layer 3: Linear(32, 32) + ReLU
        h = jnp.dot(h.astype(cd), w3_ref[...].astype(cd), preferred_element_type=jnp.float32)
        h = jnp.maximum(h + b3_ref[...], 0.0)
        # Layer 4: Linear(32, 2), no activation.
        o_ref[...] = (jnp.dot(h.astype(cd), w4_ref[...].astype(cd),
                              preferred_element_type=jnp.float32) + b4_ref[...])
    return mlp_kernel


def _round_up(v, m):
    return ((v + m - 1) // m) * m


def _choose_tiles(batch, block_batch, min_split=512):
    """Pick (num_tiles, batch_tile).  Single full block for small B; otherwise fat tiles
    rounded to a multiple of 128 (sublane + bf16 packing friendly), with >= 2 grid steps once
    B >= min_split so a v7x megacore can shard the 'parallel' axis across both TensorCores."""
    num_tiles = pl.cdiv(batch, block_batch)
    if num_tiles == 1 and batch >= min_split:
        num_tiles = 2
    if num_tiles == 1:
        return 1, batch                       # block == full array -> any B is legal
    bb = _round_up(pl.cdiv(batch, num_tiles), 128)
    return pl.cdiv(batch, bb), bb             # last block may be partial (handled by Pallas)


def mlp_forward(x, params, *, block_batch=2048, compute_dtype=jnp.bfloat16):
    """x: (B, input_dim) float32.  params: weights (in_dim, out_dim), biases (1, out_dim).

    Returns float32 (B, 2).  Arbitrary B is handled without any host-side padding/copies.
    compute_dtype=jnp.float32 reproduces the PyTorch float32 semantics exactly;
    the default bf16 streams the MXU-native dtype while accumulating/biasing/ReLU in f32.
    """
    B, input_dim = x.shape
    out_dim = params["w4"].shape[1]
    num_tiles, bb = _choose_tiles(B, block_batch)

    w = [params[f"w{i}"] for i in range(1, 5)]
    b = [params[f"b{i}"].astype(jnp.float32) for i in range(1, 5)]

    def const_spec(shape):
        # Weights/biases: same full block every grid step (constant index -> fetched once).
        return pl.BlockSpec(shape, lambda i, n=len(shape): (0,) * n)

    in_specs = [pl.BlockSpec((bb, input_dim), lambda i: (i, 0))]   # x batch tile
    operands = [x]
    for wi, bi in zip(w, b):
        in_specs += [const_spec(wi.shape), const_spec(bi.shape)]
        operands += [wi, bi]

    # Advisory cost estimate for XLA scheduling around the custom call.
    flops = 2 * B * sum(din * dout for (din, dout) in (wi.shape for wi in w))
    param_bytes = sum(int(a.size) * a.dtype.itemsize for a in operands[1:])
    cost = pl.CostEstimate(
        flops=flops,
        transcendentals=0,
        bytes_accessed=int(x.size) * x.dtype.itemsize + B * out_dim * 4 + param_bytes,
    )

    # VMEM budget: 2x f32 x tile + activations + 2x lane-padded out tile + params; clamp to a
    # range that is safe on every generation (v7x has 64 MiB physical / 32 MiB default scoped).
    vmem_budget = (2 * bb * input_dim * 4 + 3 * bb * 128 * 4
                   + 2 * bb * 128 * 4 + 2 * param_bytes)
    vmem_limit = int(min(max(2 * vmem_budget, 32 * 1024 * 1024), 48 * 1024 * 1024))

    return pl.pallas_call(
        make_mlp_kernel(compute_dtype),
        out_shape=jax.ShapeDtypeStruct((B, out_dim), jnp.float32),
        grid_spec=pltpu.PrefetchScalarGridSpec(
            num_scalar_prefetch=0,
            grid=(num_tiles,),
            in_specs=in_specs,
            out_specs=pl.BlockSpec((bb, out_dim), lambda i: (i, 0)),
        ),
        compiler_params=pltpu.CompilerParams(
            dimension_semantics=("parallel",),     # megacore-shardable on v7x when >= 2 steps
            vmem_limit_bytes=vmem_limit,
        ),
        cost_estimate=cost,
    )(*operands)


def init_params(key, input_dim, hidden_dim=128):
    """Deterministic init mirroring the PyTorch module's layer shapes.
    Weights stored as (in_dim, out_dim) so the kernel computes x @ W + b
    (equivalent to PyTorch's x @ W.T + b with W of shape (out, in))."""
    dims = [(input_dim, hidden_dim), (hidden_dim, 32), (32, 32), (32, 2)]
    params = {}
    for idx, (din, dout) in enumerate(dims, start=1):
        key, kw, kb = jax.random.split(key, 3)
        bound = 1.0 / float(din) ** 0.5     # PyTorch default uniform(-1/sqrt(fan_in), +)
        params[f"w{idx}"] = jax.random.uniform(kw, (din, dout), jnp.float32, -bound, bound)
        params[f"b{idx}"] = jax.random.uniform(kb, (1, dout), jnp.float32, -bound, bound)
    return params


def mlp_reference(x, params, compute_dtype=jnp.float32):
    """Pure-JAX reference. compute_dtype mirrors the kernel's streamed-operand precision."""
    def layer(h, w_, b_, act):
        y = jnp.dot(h.astype(compute_dtype), w_.astype(compute_dtype),
                    preferred_element_type=jnp.float32) + b_
        return jnp.maximum(y, 0.0) if act else y

    h = layer(x, params["w1"], params["b1"], True)
    h = layer(h, params["w2"], params["b2"], True)
    h = layer(h, params["w3"], params["b3"], True)
    return layer(h, params["w4"], params["b4"], False)


if __name__ == "__main__":
    key = jax.random.PRNGKey(0)
    k_x, k_p, k_x2 = jax.random.split(key, 3)

    batch, input_dim, hidden_dim = 8, 16, 128
    x = jax.random.normal(k_x, (batch, input_dim), jnp.float32)
    params = init_params(k_p, input_dim, hidden_dim)

    # Small batch: collapses to grid=(1,), one fused invocation.
    out = jax.block_until_ready(mlp_forward(x, params))
    assert out.shape == (batch, 2)
    ref_mixed = mlp_reference(x, params, compute_dtype=jnp.bfloat16)   # same precision as kernel
    ref_f32 = mlp_reference(x, params, compute_dtype=jnp.float32)      # original module semantics
    assert jnp.allclose(out, ref_mixed, atol=2e-3, rtol=2e-3), "mismatch vs mixed-precision ref"
    assert jnp.allclose(out, ref_f32, atol=5e-2, rtol=5e-2), "mismatch vs f32 reference"

    # Full-float32 path: matches the PyTorch module's precision.
    out_f32 = jax.block_until_ready(mlp_forward(x, params, compute_dtype=jnp.float32))
    assert jnp.allclose(out_f32, ref_f32, atol=1e-3, rtol=1e-3), "mismatch vs f32 ref (f32 path)"

    # Ragged batch, multi-step 'parallel' grid: 3 tiles of 128 rows, partial last block,
    # no host-side padding copy.
    batch2 = 300
    x2 = jax.random.normal(k_x2, (batch2, input_dim), jnp.float32)
    out2 = jax.block_until_ready(mlp_forward(x2, params, block_batch=128))
    assert out2.shape == (batch2, 2)
    ref2 = mlp_reference(x2, params, compute_dtype=jnp.bfloat16)
    assert jnp.allclose(out2, ref2, atol=2e-3, rtol=2e-3), "mismatch vs ref (ragged batch)"

    print("KERNEL_OK")
</pallas_src>

<mosaic_0001>
module attributes {stable_mosaic.version = 11 : i64} {
  func.func @mlp_kernel(%arg0: i32, %arg1: memref<8x16xf32, #tpu.memory_space<vmem>>, %arg2: memref<16x128xf32, #tpu.memory_space<vmem>>, %arg3: memref<1x128xf32, #tpu.memory_space<vmem>>, %arg4: memref<128x32xf32, #tpu.memory_space<vmem>>, %arg5: memref<1x32xf32, #tpu.memory_space<vmem>>, %arg6: memref<32x32xf32, #tpu.memory_space<vmem>>, %arg7: memref<1x32xf32, #tpu.memory_space<vmem>>, %arg8: memref<32x2xf32, #tpu.memory_space<vmem>>, %arg9: memref<1x2xf32, #tpu.memory_space<vmem>>, %arg10: memref<8x2xf32, #tpu.memory_space<vmem>>) attributes {dimension_semantics = [#tpu.dimension_semantics<parallel>], iteration_bounds = array<i64: 1>, scalar_prefetch = 0 : i64, scratch_operands = 0 : i64, tpu.core_type = #tpu.core_type<tc>, window_params = [{transform_indices = @transform_0, window_bounds = array<i64: 8, 16>}, {pipeline_mode = #tpu.pipeline_mode<synchronous>, transform_indices = @transform_1, window_bounds = array<i64: 16, 128>}, {pipeline_mode = #tpu.pipeline_mode<synchronous>, transform_indices = @transform_2, window_bounds = array<i64: 1, 128>}, {pipeline_mode = #tpu.pipeline_mode<synchronous>, transform_indices = @transform_3, window_bounds = array<i64: 128, 32>}, {pipeline_mode = #tpu.pipeline_mode<synchronous>, transform_indices = @transform_4, window_bounds = array<i64: 1, 32>}, {pipeline_mode = #tpu.pipeline_mode<synchronous>, transform_indices = @transform_5, window_bounds = array<i64: 32, 32>}, {pipeline_mode = #tpu.pipeline_mode<synchronous>, transform_indices = @transform_6, window_bounds = array<i64: 1, 32>}, {pipeline_mode = #tpu.pipeline_mode<synchronous>, transform_indices = @transform_7, window_bounds = array<i64: 32, 2>}, {pipeline_mode = #tpu.pipeline_mode<synchronous>, transform_indices = @transform_8, window_bounds = array<i64: 1, 2>}, {transform_indices = @transform_9, window_bounds = array<i64: 8, 2>}]} {
    %c0 = arith.constant 0 : index
    %c0_0 = arith.constant 0 : index
    %0 = vector.load %arg1[%c0, %c0_0] : memref<8x16xf32, #tpu.memory_space<vmem>>, vector<8x16xf32>
    %1 = arith.truncf %0 : vector<8x16xf32> to vector<8x16xbf16>
    %c0_1 = arith.constant 0 : index
    %c0_2 = arith.constant 0 : index
    %2 = vector.load %arg2[%c0_1, %c0_2] : memref<16x128xf32, #tpu.memory_space<vmem>>, vector<16x128xf32>
    %3 = arith.truncf %2 : vector<16x128xf32> to vector<16x128xbf16>
    %cst = arith.constant dense<0.000000e+00> : vector<8x128xf32>
    %4 = tpu.matmul %1, %3, %cst {dimension_numbers = #tpu.dot_dimension_numbers<[1], [0], [0], [1], [0, 0, 1, 1], [], []>} : vector<8x16xbf16>, vector<16x128xbf16>, vector<8x128xf32> -> vector<8x128xf32>
    %c0_3 = arith.constant 0 : index
    %c0_4 = arith.constant 0 : index
    %5 = vector.load %arg3[%c0_3, %c0_4] : memref<1x128xf32, #tpu.memory_space<vmem>>, vector<1x128xf32>
    %6 = vector.broadcast %5 : vector<1x128xf32> to vector<8x128xf32>
    %7 = arith.addf %4, %6 : vector<8x128xf32>
    %cst_5 = arith.constant 0.000000e+00 : f32
    %8 = vector.broadcast %cst_5 : f32 to vector<8x128xf32>
    %9 = arith.maximumf %7, %8 : vector<8x128xf32>
    %10 = arith.truncf %9 : vector<8x128xf32> to vector<8x128xbf16>
    %c0_6 = arith.constant 0 : index
    %c0_7 = arith.constant 0 : index
    %11 = vector.load %arg4[%c0_6, %c0_7] : memref<128x32xf32, #tpu.memory_space<vmem>>, vector<128x32xf32>
    %12 = arith.truncf %11 : vector<128x32xf32> to vector<128x32xbf16>
    %cst_8 = arith.constant dense<0.000000e+00> : vector<8x32xf32>
    %13 = tpu.matmul %10, %12, %cst_8 {dimension_numbers = #tpu.dot_dimension_numbers<[1], [0], [0], [1], [0, 0, 1, 1], [], []>} : vector<8x128xbf16>, vector<128x32xbf16>, vector<8x32xf32> -> vector<8x32xf32>
    %c0_9 = arith.constant 0 : index
    %c0_10 = arith.constant 0 : index
    %14 = vector.load %arg5[%c0_9, %c0_10] : memref<1x32xf32, #tpu.memory_space<vmem>>, vector<1x32xf32>
    %15 = vector.broadcast %14 : vector<1x32xf32> to vector<8x32xf32>
    %16 = arith.addf %13, %15 : vector<8x32xf32>
    %cst_11 = arith.constant 0.000000e+00 : f32
    %17 = vector.broadcast %cst_11 : f32 to vector<8x32xf32>
    %18 = arith.maximumf %16, %17 : vector<8x32xf32>
    %19 = arith.truncf %18 : vector<8x32xf32> to vector<8x32xbf16>
    %c0_12 = arith.constant 0 : index
    %c0_13 = arith.constant 0 : index
    %20 = vector.load %arg6[%c0_12, %c0_13] : memref<32x32xf32, #tpu.memory_space<vmem>>, vector<32x32xf32>
    %21 = arith.truncf %20 : vector<32x32xf32> to vector<32x32xbf16>
    %cst_14 = arith.constant dense<0.000000e+00> : vector<8x32xf32>
    %22 = tpu.matmul %19, %21, %cst_14 {dimension_numbers = #tpu.dot_dimension_numbers<[1], [0], [0], [1], [0, 0, 1, 1], [], []>} : vector<8x32xbf16>, vector<32x32xbf16>, vector<8x32xf32> -> vector<8x32xf32>
    %c0_15 = arith.constant 0 : index
    %c0_16 = arith.constant 0 : index
    %23 = vector.load %arg7[%c0_15, %c0_16] : memref<1x32xf32, #tpu.memory_space<vmem>>, vector<1x32xf32>
    %24 = vector.broadcast %23 : vector<1x32xf32> to vector<8x32xf32>
    %25 = arith.addf %22, %24 : vector<8x32xf32>
    %cst_17 = arith.constant 0.000000e+00 : f32
    %26 = vector.broadcast %cst_17 : f32 to vector<8x32xf32>
    %27 = arith.maximumf %25, %26 : vector<8x32xf32>
    %28 = arith.truncf %27 : vector<8x32xf32> to vector<8x32xbf16>
    %c0_18 = arith.constant 0 : index
    %c0_19 = arith.constant 0 : index
    %29 = vector.load %arg8[%c0_18, %c0_19] : memref<32x2xf32, #tpu.memory_space<vmem>>, vector<32x2xf32>
    %30 = arith.truncf %29 : vector<32x2xf32> to vector<32x2xbf16>
    %cst_20 = arith.constant dense<0.000000e+00> : vector<8x2xf32>
    %31 = tpu.matmul %28, %30, %cst_20 {dimension_numbers = #tpu.dot_dimension_numbers<[1], [0], [0], [1], [0, 0, 1, 1], [], []>} : vector<8x32xbf16>, vector<32x2xbf16>, vector<8x2xf32> -> vector<8x2xf32>
    %c0_21 = arith.constant 0 : index
    %c0_22 = arith.constant 0 : index
    %32 = vector.load %arg9[%c0_21, %c0_22] : memref<1x2xf32, #tpu.memory_space<vmem>>, vector<1x2xf32>
    %33 = vector.broadcast %32 : vector<1x2xf32> to vector<8x2xf32>
    %34 = arith.addf %31, %33 : vector<8x2xf32>
    %c0_23 = arith.constant 0 : index
    %c0_24 = arith.constant 0 : index
    %35 = vector.load %arg10[%c0_23, %c0_24] : memref<8x2xf32, #tpu.memory_space<vmem>>, vector<8x2xf32>
    tpu.vector_store %arg10[%c0_23, %c0_24], %34 {strides = array<i32>} : memref<8x2xf32, #tpu.memory_space<vmem>>, vector<8x2xf32>,
    return
  }
  func.func @transform_0(%arg0: i32) -> (i32, i32) {
    %c0_i32 = arith.constant 0 : i32
    %c0_i32_0 = arith.constant 0 : i32
    return %arg0, %c0_i32 : i32, i32
  }
  func.func @transform_1(%arg0: i32) -> (i32, i32) {
    %c0_i32 = arith.constant 0 : i32
    %c0_i32_0 = arith.constant 0 : i32
    %c0_i32_1 = arith.constant 0 : i32
    return %c0_i32, %c0_i32_0 : i32, i32
  }
  func.func @transform_2(%arg0: i32) -> (i32, i32) {
    %c0_i32 = arith.constant 0 : i32
    %c0_i32_0 = arith.constant 0 : i32
    %c0_i32_1 = arith.constant 0 : i32
    return %c0_i32, %c0_i32_0 : i32, i32
  }
  func.func @transform_3(%arg0: i32) -> (i32, i32) {
    %c0_i32 = arith.constant 0 : i32
    %c0_i32_0 = arith.constant 0 : i32
    %c0_i32_1 = arith.constant 0 : i32
    return %c0_i32, %c0_i32_0 : i32, i32
  }
  func.func @transform_4(%arg0: i32) -> (i32, i32) {
    %c0_i32 = arith.constant 0 : i32
    %c0_i32_0 = arith.constant 0 : i32
    %c0_i32_1 = arith.constant 0 : i32
    return %c0_i32, %c0_i32_0 : i32, i32
  }
  func.func @transform_5(%arg0: i32) -> (i32, i32) {
    %c0_i32 = arith.constant 0 : i32
    %c0_i32_0 = arith.constant 0 : i32
    %c0_i32_1 = arith.constant 0 : i32
    return %c0_i32, %c0_i32_0 : i32, i32
  }
  func.func @transform_6(%arg0: i32) -> (i32, i32) {
    %c0_i32 = arith.constant 0 : i32
    %c0_i32_0 = arith.constant 0 : i32
    %c0_i32_1 = arith.constant 0 : i32
    return %c0_i32, %c0_i32_0 : i32, i32
  }
  func.func @transform_7(%arg0: i32) -> (i32, i32) {
    %c0_i32 = arith.constant 0 : i32
    %c0_i32_0 = arith.constant 0 : i32
    %c0_i32_1 = arith.constant 0 : i32
    return %c0_i32, %c0_i32_0 : i32, i32
  }
  func.func @transform_8(%arg0: i32) -> (i32, i32) {
    %c0_i32 = arith.constant 0 : i32
    %c0_i32_0 = arith.constant 0 : i32
    %c0_i32_1 = arith.constant 0 : i32
    return %c0_i32, %c0_i32_0 : i32, i32
  }
  func.func @transform_9(%arg0: i32) -> (i32, i32) {
    %c0_i32 = arith.constant 0 : i32
    %c0_i32_0 = arith.constant 0 : i32
    return %arg0, %c0_i32 : i32, i32
  }
}

</mosaic_0001>

<bundles_post_ra>
// kernel: tpu_custom_call.1
= control target key start
LH: loop header
LB: loop body
LE: loop exit
PB: predicated region body
PF: predicated region fallthrough
CT: control target
= control target key end

     0   :  { %v353_v0 = vmov 0.0   ;;  %vm354_vm0 = vmmov 0   ;;  %vm45_vm1 = vcmask 130048   ;;  %vm177_vm2 = vcmask 261120   ;;  %s524_s1 = inlined_call_operand.vmem [shape: f32[16,128], index: 1, kind: input, shape index: {}]   ;;  %s525_s0 = inlined_call_operand.vmem [shape: f32[8,16], index: 0, kind: input, shape index: {}]   ;;  %s526_s3 = inlined_call_operand.vmem [shape: f32[128,32], index: 3, kind: input, shape index: {}]   ;;  %s527_s5 = inlined_call_operand.vmem [shape: f32[32,32], index: 5, kind: input, shape index: {}]   ;;  %s528_s2 = inlined_call_operand.vmem [shape: f32[1,128], index: 2, kind: input, shape index: {}]   ;;  %s529_s4 = inlined_call_operand.vmem [shape: f32[1,32], index: 4, kind: input, shape index: {}]   ;;  %s530_s7 = inlined_call_operand.vmem [shape: f32[32,2], index: 7, kind: input, shape index: {}]   ;;  %s531_s6 = inlined_call_operand.vmem [shape: f32[1,32], index: 6, kind: input, shape index: {}]   ;;  %s532_s8 = inlined_call_operand.vmem [shape: f32[1,2], index: 8, kind: input, shape index: {}]   ;;  %s533_s9 = inlined_call_operand.vmem [shape: f32[8,2], index: 9, kind: output, shape index: {}]  }
   0x1   :  { %309 = vmatprep.subr.bf16.mxu0 %v353_v0  ;;  %v35_v1 = vld [vmem:[%s524_s1] sm:$0xff]  ;;  %v36_v2 = vld [vmem:[%s524_s1 + $0x8] sm:$0xff]  ;;  %311 = vmatprep.mubr.msk.bf16.mxu0 %vm354_vm0, %v353_v0  ;;  %v93_v7 = vld [vmem:[%s526_s3 + $0x10] sm:$0xff]  ;;  %vm279_vm3 = vcmask 15360  }
   0x2   :  { %v33_v3 = vld [vmem:[%s525_s0] sm:$0xff]  ;;  %v37_v4 = vpack.c.bf16 %v36_v2, %v35_v1  ;;  %315 = vmatprep.subr.bf16.mxu1 %v353_v0  ;;  %v92_v6 = vld [vmem:[%s526_s3 + $0x8] sm:$0xff]  ;;  %331 = vmatprep.mubr.msk.bf16.mxu1 %vm354_vm0, %v353_v0  ;;  %v94_v10 = vld [vmem:[%s526_s3 + $0x18] sm:$0xff] }
   0x3   :  { %v91_v5 = vld [vmem:[%s526_s3] sm:$0xff]  ;;  %v34_v8 = vpack.c.bf16 %v33_v3, %v33_v3  ;;  %v108_v11 = vpack.c.bf16 %v94_v10, %v93_v7  ;;  %v96_v13 = vld [vmem:[%s526_s3 + $0x28] sm:$0xff]  ;;  %v97_v15 = vld [vmem:[%s526_s3 + $0x30] sm:$0xff] }
   0x4   :  { %v107_v9 = vpack.c.bf16 %v92_v6, %v91_v5  ;;  %310 = vmatpush3.bf16.msra.mxu0 %v37_v4  ;;  %v95_v12 = vld [vmem:[%s526_s3 + $0x20] sm:$0xff]  ;;  %v98_v16 = vld [vmem:[%s526_s3 + $0x38] sm:$0xff]  ;;  %v100_v19 = vld [vmem:[%s526_s3 + $0x48] sm:$0xff] }
   0x5   :  { %335 = vmatprep.subr.bf16.mxu0 %v353_v0  ;;  %v109_v14 = vpack.c.bf16 %v96_v13, %v95_v12  ;;  %v110_v17 = vpack.c.bf16 %v98_v16, %v97_v15  ;;  %v99_v18 = vld [vmem:[%s526_s3 + $0x40] sm:$0xff]  ;;  %v101_v21 = vld [vmem:[%s526_s3 + $0x50] sm:$0xff]  ;;  %v102_v22 = vld [vmem:[%s526_s3 + $0x58] sm:$0xff] }
   0x6   :  { %316 = vmatpush3.bf16.msra.mxu1 %v107_v9  ;;  %v111_v20 = vpack.c.bf16 %v100_v19, %v99_v18  ;;  %v112_v23 = vpack.c.bf16 %v102_v22, %v101_v21  ;;  %v103_v24 = vld [vmem:[%s526_s3 + $0x60] sm:$0xff]  ;;  %v104_v25 = vld [vmem:[%s526_s3 + $0x68] sm:$0xff]  ;;  %v105_v27 = vld [vmem:[%s526_s3 + $0x70] sm:$0xff] }
   0x7   :  { %317 = vmatprep.subr.bf16.mxu1 %v353_v0  ;;  %312 = vmatmul.mubr.msk.bf16.vlgmr.msra.gmra.mrb[0].mxu0 %vm45_vm1, %v34_v8  ;;  %v113_v26 = vpack.c.bf16 %v104_v25, %v103_v24  ;;  %v106_v28 = vld [vmem:[%s526_s3 + $0x78] sm:$0xff]  ;;  %v164_v30 = vld [vmem:[%s527_s5] sm:$0xff]  ;;  %v165_v31 = vld [vmem:[%s527_s5 + $0x8] sm:$0xff] }
   0x8   :  { %339 = vmatprep.mubr.msk.bf16.mxu0 %vm354_vm0, %v353_v0  ;;  %v114_v29 = vpack.c.bf16 %v106_v28, %v105_v27  ;;  %v168_v32 = vpack.c.bf16 %v165_v31, %v164_v30  ;;  %v285_v33 = vld [vmem:[%s528_s2] ss:$0 sm:$0xff]  ;;  %v166_v41 = vld [vmem:[%s527_s5 + $0x10] sm:$0xff]  ;;  %v167_v42 = vld [vmem:[%s527_s5 + $0x18] sm:$0xff] }
   0x9   :  { %v169_v43 = vpack.c.bf16 %v167_v42, %v166_v41  ;;  %v287_v44 = vld [vmem:[%s529_s4] ss:$0 sm:$0xff]  ;;  %v224_v49 = vld [vmem:[%s530_s7 + $0x8] sm:$0xff]  ;;  %v225_v55 = vld [vmem:[%s530_s7 + $0x10] sm:$0xff] }
   0xa   :  { %318 = vmatpush3.bf16.msra.mxu1 %v108_v11  ;;  %336 = vmatpush3.bf16.msra.mxu0 %v168_v32  ;;  %v223_v48 = vld [vmem:[%s530_s7] sm:$0xff]  ;;  %v226_v56 = vld [vmem:[%s530_s7 + $0x18] sm:$0xff] }
   0xb   :  { %319 = vmatprep.subr.bf16.mxu1 %v353_v0  ;;  %337 = vmatprep.subr.bf16.mxu0 %v353_v0  ;;  %v227_v53 = vpack.c.bf16 %v224_v49, %v223_v48  ;;  %v228_v57 = vpack.c.bf16 %v226_v56, %v225_v55  ;;  %v288_v58 = vld [vmem:[%s531_s6] ss:$0 sm:$0xff] }
   0xc   :  { %v290_v2 = vld [vmem:[%s532_s8] ss:$0 sm:$0xff] }
   0xe   :  { %320 = vmatpush3.bf16.msra.mxu1 %v109_v14  ;;  %338 = vmatpush3.bf16.msra.mxu0 %v169_v43 }
   0xf   :  { %321 = vmatprep.subr.bf16.mxu1 %v353_v0  ;;  %343 = vmatprep.subr.bf16.mxu0 %v353_v0 }
  0x12   :  { %322 = vmatpush3.bf16.msra.mxu1 %v110_v17 }
  0x13   :  { %323 = vmatprep.subr.bf16.mxu1 %v353_v0 }
  0x16   :  { %324 = vmatpush3.bf16.msra.mxu1 %v111_v20 }
  0x17   :  { %325 = vmatprep.subr.bf16.mxu1 %v353_v0 }
  0x1a   :  { %326 = vmatpush3.bf16.msra.mxu1 %v112_v23 }
  0x1b   :  { %327 = vmatprep.subr.bf16.mxu1 %v353_v0 }
  0x1e   :  { %328 = vmatpush3.bf16.msra.mxu1 %v113_v26 }
  0x1f   :  { %329 = vmatprep.subr.bf16.mxu1 %v353_v0 }
  0x22   :  { %330 = vmatpush3.bf16.msra.mxu1 %v114_v29 }
  0xda   :  { %v83_v34 = vpop.f32.mrb[0].mxu0 }
  0xdb   :  { %v84_v35 = vadd.f32 %v285_v33, %v83_v34  ;;  %v313_v36 = vpop.f32.mrb[1].mxu0 }
  0xdc   :  { %v86_v37 = vpop.f32.mrb[2].mxu0 }
  0xdd   :  { %v89_v38 = vmax.f32 %v84_v35, 0.0  ;;  %v314_v39 = vpop.f32.mrb[3].mxu0 }
  0xdf   :  { %v90_v40 = vpack.c.bf16 %v89_v38, %v89_v38 }
  0xe1   :  { %332 = vmatmul.mubr.bf16.vlgmr.msra.gmra.mrb[0].mxu1 %v90_v40 }
 0x1b4   :  { %v156_v45 = vpop.f32.mrb[0].mxu1 }
 0x1b5   :  { %v157_v46 = vadd.f32 %v287_v44, %v156_v45  ;;  %v333_v47 = vpop.f32.mrb[1].mxu1 }
 0x1b6   :  { %v159_v50 = vpop.f32.mrb[2].mxu1 }
 0x1b7   :  { %v162_v51 = vmax.f32 %v157_v46, 0.0  ;;  %v334_v52 = vpop.f32.mrb[3].mxu1 }
 0x1b9   :  { %v163_v54 = vpack.c.bf16 %v162_v51, %v162_v51 }
 0x1bb   :  { %340 = vmatmul.mubr.msk.bf16.vlgmr.msra.gmra.mrb[4].mxu0 %vm177_vm2, %v163_v54 }
 0x1bc   :  { %344 = vmatpush3.bf16.msra.mxu0 %v227_v53  ;;  %347 = vmatprep.mubr.msk.bf16.mxu0 %vm354_vm0, %v353_v0 }
 0x1bd   :  { %345 = vmatprep.subr.bf16.mxu0 %v353_v0 }
 0x1c0   :  { %346 = vmatpush3.bf16.msra.mxu0 %v228_v57 }
 0x28e   :  { %v215_v59 = vpop.f32.mrb[4].mxu0 }
 0x28f   :  { %v216_v60 = vadd.f32 %v288_v58, %v215_v59  ;;  %v341_v61 = vpop.f32.mrb[5].mxu0 }
 0x290   :  { %v218_v62 = vpop.f32.mrb[6].mxu0 }
 0x291   :  { %v221_v63 = vmax.f32 %v216_v60, 0.0  ;;  %v342_v0 = vpop.f32.mrb[7].mxu0 }
 0x293   :  { %v222_v1 = vpack.c.bf16 %v221_v63, %v221_v63 }
 0x295   :  { %348 = vmatmul.mubr.msk.bf16.vlgmr.msra.gmra.mrb[8].mxu0 %vm177_vm2, %v222_v1 }
 0x368   :  { %v273_v3 = vpop.f32.mrb[8].mxu0 }
 0x369   :  { %v274_v4 = vadd.f32 %v290_v2, %v273_v3  ;;  %v349_v5 = vpop.f32.mrb[9].mxu0 }
 0x36a   :  { %v276_v6 = vpop.f32.mrb[10].mxu0 }
 0x36b   :  { %280 = vst.msk [vmem:[%s533_s9] sm:$0xff] %vm279_vm3, %v274_v4  ;;  %v350_v7 = vpop.f32.mrb[11].mxu0 }

</bundles_post_ra>
